<compile_context>
chip_gen: v5e
topology: v5e:2x2
jax: 0.10.0
libtpu: 0.0.40
codegen_flags: <defaults>
</compile_context>

<pallas_src>
import math
import functools

import numpy as np
import jax
import jax.numpy as jnp
from jax.experimental import pallas as pl
from jax.experimental.pallas import tpu as pltpu


def _moving_avg_kernel(p_ref, x_ref, o_ref, *, scale):
    # p_ref: (L_out, L)   pooling matrix (same block every step -> resident)
    # x_ref: (bt, L, tc)  batch tile x channel tile of the input
    # o_ref: (bt, L_out, tc)
    p = p_ref[...]
    for b in range(x_ref.shape[0]):           # static unroll over the batch tile
        acc = jnp.dot(p, x_ref[b], preferred_element_type=jnp.float32)
        if scale is not None:                 # only the bf16-P path needs this
            acc = acc * scale
        o_ref[b] = acc.astype(o_ref.dtype)


def _pool_matrix(L, kernel_size, stride, front_rep):
    """Banded pooling-count matrix that also encodes the replicate padding."""
    L_pad = L + kernel_size - 1               # front_rep + end_rep = K - 1
    L_out = (L_pad - kernel_size) // stride + 1
    t = np.arange(L_out)[:, None]
    k = np.arange(kernel_size)[None, :]
    cols = np.clip(t * stride + k - front_rep, 0, L - 1)
    rows = np.broadcast_to(t, cols.shape)
    P = np.zeros((L_out, L), np.float32)
    np.add.at(P, (rows.reshape(-1), cols.reshape(-1)), 1.0)
    return P, L_out


def _vmem_capacity_bytes():
    """Physical VMEM of the current chip; conservative fallback (v7x = 64 MiB)."""
    try:
        info = pltpu.get_tpu_info()
        cap = getattr(info, "vmem_capacity_bytes", None)
        if cap:
            return int(cap)
    except Exception:
        pass
    return 64 * 1024 * 1024


def _choose_tiles(B, L, L_out, C, itemsize, p_bytes, vmem_cap):
    """Pick (batch_tile, channel_tile).

    * channel tile is a multiple of 128 (lane-dense loads/stores; ragged edge is
      handled by the writeback DMA only),
    * batch tile packs several batch elements per grid step (~1 MiB per step),
    * everything is sized against the chip's actual VMEM capacity so the same
      code stays inside v7x's 64 MiB as well as v5e/v6e's 128 MiB.
    """
    budget = max(vmem_cap // 4, 8 * 1024 * 1024)          # per-step, double-buffered
    c_padded = ((C + 127) // 128) * 128
    tc_cap = budget // max(1, 2 * (L + L_out) * itemsize)
    tc = max(128, min((tc_cap // 128) * 128, c_padded))

    per_batch = (L + L_out) * tc * itemsize                # one batch's in+out block
    bt = max(1, min(B, (1 << 20) // max(1, per_batch)))    # target ~1 MiB per step
    while bt > 1 and 2 * bt * per_batch + 2 * p_bytes > budget:
        bt -= 1

    # v7x has 2 TensorCores: make sure the parallel grid exposes >= 2 steps.
    if pl.cdiv(B, bt) * pl.cdiv(C, tc) < 2:
        if C >= 256 and tc > 128:
            tc = max(128, ((tc // 2 + 127) // 128) * 128)  # split channel axis
        elif bt > 1:
            bt = (B + 1) // 2                              # split batch axis
    return bt, tc


def moving_avg(x, kernel_size, stride):
    """Equivalent of moving_avg.forward for x of shape (B, L, C)."""
    B, L, C = x.shape
    front_rep = kernel_size - 1 - math.floor((kernel_size - 1) // 2)

    P_np, L_out = _pool_matrix(L, kernel_size, stride, front_rep)
    if x.dtype == jnp.bfloat16:
        # Small-integer counts are exact in bf16 -> fast bf16 x bf16 MXU matmul;
        # the 1/K scale stays in f32 after accumulation for accuracy.
        P = jnp.asarray(P_np, dtype=jnp.bfloat16)
        scale = 1.0 / kernel_size
    else:
        # Fold 1/K into P so the kernel epilogue is only a dtype cast.
        P = jnp.asarray(P_np * (1.0 / kernel_size), dtype=jnp.float32)
        scale = None

    itemsize = jnp.dtype(x.dtype).itemsize
    p_bytes = P.size * jnp.dtype(P.dtype).itemsize
    vmem_cap = _vmem_capacity_bytes()

    bt, tc = _choose_tiles(B, L, L_out, C, itemsize, p_bytes, vmem_cap)
    grid = (pl.cdiv(B, bt), pl.cdiv(C, tc))

    # Always pass an explicit, generation-aware VMEM limit:
    # double-buffered in/out blocks + (double-buffered) resident P + slack.
    need = 2 * bt * (L + L_out) * tc * itemsize + 2 * p_bytes + (2 << 20)
    vmem_limit = int(min(vmem_cap, max(need, 16 * 1024 * 1024)))

    kernel = functools.partial(_moving_avg_kernel, scale=scale)

    cost = pl.CostEstimate(
        flops=2 * B * L_out * L * C,
        transcendentals=0,
        bytes_accessed=x.size * itemsize + B * L_out * C * itemsize + p_bytes,
    )

    return pl.pallas_call(
        kernel,
        out_shape=jax.ShapeDtypeStruct((B, L_out, C), x.dtype),
        grid=grid,
        in_specs=[
            # Pooling matrix: same block every step -> resident in VMEM.
            # TODO(synk): for very long sequences (L >~ 2k in f32) band-tile P /
            # the contraction axis so its O(L*L_out) footprint and the wasted
            # dense-MXU flops don't dominate (matters most on v7x's 64 MiB VMEM).
            pl.BlockSpec((L_out, L), lambda bi, ci: (0, 0)),
            pl.BlockSpec((bt, L, tc), lambda bi, ci: (bi, 0, ci)),
        ],
        out_specs=pl.BlockSpec((bt, L_out, tc), lambda bi, ci: (bi, 0, ci)),
        compiler_params=pltpu.CompilerParams(
            dimension_semantics=("parallel", "parallel"),
            vmem_limit_bytes=vmem_limit,
        ),
        cost_estimate=cost,
    )(P, x)


def _moving_avg_ref(x, kernel_size, stride):
    """Pure-JAX reference matching the PyTorch module's semantics exactly."""
    front_rep = kernel_size - 1 - math.floor((kernel_size - 1) // 2)
    end_rep = math.floor((kernel_size - 1) // 2)
    front = jnp.repeat(x[:, 0:1, :], front_rep, axis=1)
    end = jnp.repeat(x[:, -1:, :], end_rep, axis=1)
    xp = jnp.concatenate([front, x, end], axis=1)
    L_pad = xp.shape[1]
    L_out = (L_pad - kernel_size) // stride + 1
    outs = [jnp.mean(xp[:, t * stride:t * stride + kernel_size, :], axis=1)
            for t in range(L_out)]
    return jnp.stack(outs, axis=1)


if __name__ == "__main__":
    key = jax.random.PRNGKey(0)

    # Primary config (matches the module's (batch, time, feature) layout).
    B, L, C = 2, 8, 32
    kernel_size, stride = 5, 1
    x = jax.random.normal(key, (B, L, C), dtype=jnp.float32)
    out = jax.block_until_ready(moving_avg(x, kernel_size, stride))
    ref = _moving_avg_ref(x, kernel_size, stride)
    assert out.shape == ref.shape, (out.shape, ref.shape)
    assert jnp.allclose(out, ref, atol=1e-5, rtol=1e-5), "mismatch vs reference (K=5, s=1)"

    # ETSformer-style large window, and stride > 1.
    x2 = jax.random.normal(jax.random.PRNGKey(1), (2, 32, 32), dtype=jnp.float32)
    out2 = jax.block_until_ready(moving_avg(x2, 25, 1))
    ref2 = _moving_avg_ref(x2, 25, 1)
    assert out2.shape == ref2.shape
    assert jnp.allclose(out2, ref2, atol=1e-5, rtol=1e-5), "mismatch vs reference (K=25, s=1)"

    out3 = jax.block_until_ready(moving_avg(x2, 5, 2))
    ref3 = _moving_avg_ref(x2, 5, 2)
    assert out3.shape == ref3.shape
    assert jnp.allclose(out3, ref3, atol=1e-5, rtol=1e-5), "mismatch vs reference (K=5, s=2)"

    # bf16 path (counts-only P + separate f32 scale).
    xb = x2.astype(jnp.bfloat16)
    out4 = jax.block_until_ready(moving_avg(xb, 5, 1))
    ref4 = _moving_avg_ref(xb.astype(jnp.float32), 5, 1)
    assert out4.shape == ref4.shape
    assert jnp.allclose(out4.astype(jnp.float32), ref4, atol=2e-2, rtol=2e-2), \
        "mismatch vs reference (bf16)"

    print("KERNEL_OK")
</pallas_src>

<mosaic_0001>
module attributes {stable_mosaic.version = 11 : i64} {
  func.func @_moving_avg_kernel(%arg0: i32, %arg1: i32, %arg2: memref<8x8xf32, #tpu.memory_space<vmem>>, %arg3: memref<1x8x128xf32, #tpu.memory_space<vmem>>, %arg4: memref<1x8x128xf32, #tpu.memory_space<vmem>>) attributes {dimension_semantics = [#tpu.dimension_semantics<parallel>, #tpu.dimension_semantics<parallel>], iteration_bounds = array<i64: 2, 1>, scalar_prefetch = 0 : i64, scratch_operands = 0 : i64, tpu.core_type = #tpu.core_type<tc>, window_params = [{pipeline_mode = #tpu.pipeline_mode<synchronous>, transform_indices = @transform_0, window_bounds = array<i64: 8, 8>}, {transform_indices = @transform_1, window_bounds = array<i64: 1, 8, 128>}, {transform_indices = @transform_2, window_bounds = array<i64: 1, 8, 128>}]} {
    %c0 = arith.constant 0 : index
    %c0_0 = arith.constant 0 : index
    %0 = vector.load %arg2[%c0, %c0_0] : memref<8x8xf32, #tpu.memory_space<vmem>>, vector<8x8xf32>
    %c0_1 = arith.constant 0 : index
    %c0_2 = arith.constant 0 : index
    %c0_3 = arith.constant 0 : index
    %1 = vector.load %arg3[%c0_1, %c0_2, %c0_3] : memref<1x8x128xf32, #tpu.memory_space<vmem>>, vector<1x8x128xf32>
    %2 = vector.shape_cast %1 : vector<1x8x128xf32> to vector<8x128xf32>
    %cst = arith.constant dense<0.000000e+00> : vector<8x128xf32>
    %3 = tpu.matmul %0, %2, %cst {dimension_numbers = #tpu.dot_dimension_numbers<[1], [0], [0], [1], [0, 0, 1, 1], [], []>} : vector<8x8xf32>, vector<8x128xf32>, vector<8x128xf32> -> vector<8x128xf32>
    %c0_4 = arith.constant 0 : index
    %c0_5 = arith.constant 0 : index
    %c0_6 = arith.constant 0 : index
    %4 = vector.load %arg4[%c0_4, %c0_5, %c0_6] : memref<1x8x128xf32, #tpu.memory_space<vmem>>, vector<1x8x128xf32>
    %5 = vector.shape_cast %4 : vector<1x8x128xf32> to vector<8x128xf32>
    %6 = vector.shape_cast %3 : vector<8x128xf32> to vector<1x8x128xf32>
    tpu.vector_store %arg4[%c0_4, %c0_5, %c0_6], %6 {strides = array<i32>} : memref<1x8x128xf32, #tpu.memory_space<vmem>>, vector<1x8x128xf32>,
    return
  }
  func.func @transform_0(%arg0: i32, %arg1: i32) -> (i32, i32) {
    %c0_i32 = arith.constant 0 : i32
    %c0_i32_0 = arith.constant 0 : i32
    %c0_i32_1 = arith.constant 0 : i32
    return %c0_i32, %c0_i32_0 : i32, i32
  }
  func.func @transform_1(%arg0: i32, %arg1: i32) -> (i32, i32, i32) {
    %c0_i32 = arith.constant 0 : i32
    %c0_i32_0 = arith.constant 0 : i32
    return %arg0, %c0_i32, %arg1 : i32, i32, i32
  }
  func.func @transform_2(%arg0: i32, %arg1: i32) -> (i32, i32, i32) {
    %c0_i32 = arith.constant 0 : i32
    %c0_i32_0 = arith.constant 0 : i32
    return %arg0, %c0_i32, %arg1 : i32, i32, i32
  }
}

</mosaic_0001>

<bundles_post_ra>
// kernel: tpu_custom_call.1
= control target key start
LH: loop header
LB: loop body
LE: loop exit
PB: predicated region body
PF: predicated region fallthrough
CT: control target
= control target key end

     0   :  { %7 = vsyncpa [#allocation3], 0  ;;  %s731_s0 = inlined_call_operand.hbm [shape: f32[8,8], index: 0, kind: input, shape index: {}]   ;;  %s732_s1 = inlined_call_operand.hbm [shape: f32[2,8,32], index: 1, kind: input, shape index: {}]   ;;  %s733_s2 = inlined_call_operand.hbm [shape: f32[2,8,32], index: 2, kind: output, shape index: {}]  }
   0x1   :  { %8 = vsyncpa [#allocation6], 0 }
   0x2   :  { %10 = vsyncpa [#allocation6 + $0x1], 0 }
   0x3   :  { %11 = vsyncpa [#allocation4], 0 }
   0x4   :  { %13 = vsyncpa [#allocation4 + $0x1], 0  ;;  %s582_s9 = smov 0   ;;  %s584_s10 = smov 0  }
   0x5   :  { %s586_s11 = smov 0   ;;  %s588_s12 = smov 0  }
   0x6   :  { %s590_s13 = smov 0   ;;  %s592_s14 = smov 0  }
   0x7 LB: > { %s329_s15 = sadd.s32 4294967295, %s564_s14   ;;  %s330_s16 = sadd.s32 4294967294, %s564_s14   ;;  %s564_s14 = sphi %s592_s14, %s19_s14   ;;  %s560_s13 = sphi %s590_s13, %s745_s13   ;;  %s556_s12 = sphi %s588_s12, %s744_s12   ;;  %s552_s11 = sphi %s586_s11, %s743_s11   ;;  %s548_s10 = sphi %s584_s10, %s742_s10   ;;  %s544_s9 = sphi %s582_s9, %s741_s9  }
   0x8   : > { %p74_p0 = scmp.ne.s32.totalorder %s548_s10, %s544_s9  ;;  %p616_p1 = scmp.eq.s32.totalorder %s329_s15, 0 }
   0x9   : > { %p620_p2 = scmp.eq.s32.totalorder %s329_s15, 1  ;;  %p106_p3 = scmp.eq.s32.totalorder %s330_s16, 1 }
   0xa   : > { %p626_p4 = por %p616_p1, %p74_p0  ;;  %p331_p5 = scmp.ge.s32.totalorder %s564_s14, 1 }
   0xb   : > { %p631_p6 = por %p106_p3, %p74_p0  ;;  %p113_p7 = scmp.lt.s32.totalorder %s564_s14, 3 }
   0xc   : > { %s125_s23 = sshll.u32 %s731_s0, 4  ;;  %p333_p9 = scmp.ge.s32.totalorder %s564_s14, 2  ;;  %s126_s23 = int_to_ptr.hbm [resolvable:$true] %s125_s23 }
   0xd   : > { %p639_p8 = pnand %p331_p5, %p113_p7  ;;  %s566_s25 = smov [#allocation2]  }
   0xe   : > { %s127_s26 = sshll.u32 %s566_s25, 4  ;;  %s31_s27 = sadd.s32 1, %s560_s13  ;;  %s128_s26 = int_to_ptr.vmem [resolvable:$true] %s127_s26 }
   0xf   : > { %p353_p10 = pneg %p639_p8  ;;  %p33_p12 = scmp.ge.s32.totalorder %s31_s27, 2 }
  0x10   : > { %s61_s28 = sadd.s32 1, %s552_s11  ;;  %p68_p13 = scmp.ne.s32.totalorder %s552_s11, %s548_s10 }
  0x11   : > { %p354_p11 = pnand %p353_p10, %p616_p1  ;;  %p69_p0 = scmp.eq.s32.totalorder %s564_s14, 0 }
  0x12   : > { %s747_s27 = smov (%p33_p12, %s31_s27), 0  ;;  %p661_p5 = por %p620_p2, %p68_p13 }
  0x13   : > { %356 = dma.hbm_to_vmem [thread:$0]  (!%p354_p11), %s126_s23, 128, %s128_s26, [#allocation3]  }
  0x14   : > { %p655_p3 = por %p69_p0, %p68_p13  ;;  %s56_s3 = ssub.s32 %s560_s13, %s747_s27 }
  0x15   : > { %p366_p7 = scmp.lt.s32.totalorder %s564_s14, 2  ;;  %p59_p10 = scmp.eq.s32.totalorder %s56_s3, 0 }
  0x16   : > { %s138_s4 = sand.u32 1, %s552_s11   ;;  %s335_s7 = sshll.u32 %s560_s13, 3 }
  0x17   : > { %s334_s5 = sshll.u32 %s138_s4, 3  ;;  %s147_s16 = scalar_lea.hbm %s732_s1, %s335_s7 }
  0x18   : > { %s670_s6 = scalar_select %p59_p10, %s552_s11, %s61_s28  }
  0x19   : > { %s142_s21 = scalar_lea.vmem [#allocation5], %s334_s5  ;;  %s149_s18 = sshll.u32 %s147_s16, 4  ;;  %s150_s18 = int_to_ptr.hbm [resolvable:$true] %s149_s18 }
  0x1a   : > { %s151_s22 = sshll.u32 %s142_s21, 4  ;;  %p358_p2 = pnand %p366_p7, %p655_p3  ;;  %s152_s22 = int_to_ptr.vmem [resolvable:$true] %s151_s22 }
  0x1b   : > { %s139_s23 = scalar_lea.sflag [#allocation6], %s138_s4  ;;  %160 = sbr.rel (%p639_p8) target bundleno = 168 (0xa8), region = 28 }
  0x1c   : > { %360 = dma.hbm_to_vmem [thread:$0]  (!%p358_p2), %s150_s18, 128, %s152_s22, %s139_s23  }
  0x20   : > { %531 = dma.done.wait (%p616_p1), [#allocation3], 128  }
  0x21   : > { %533 = vsyncadd (%p616_p1), [#allocation3], 4294967168  ;;  %s685_s25 = sand.u32 1, %s548_s10  }
  0x22   : > { %s338_s26 = sshll.u32 %s685_s25, 3  ;;  %s168_s28 = scalar_lea.sflag [#allocation6], %s685_s25 }
  0x23   : > { %s171_s29 = scalar_lea.vmem [#allocation5], %s338_s26 }
  0x24   : > { %535 = dma.done.wait (%p626_p4), %s168_s28, 128  }
  0x25   : > { %537 = vsyncadd (%p626_p4), %s168_s28, 4294967168  ;;  %vm195_vm0 = vcmask 64512   ;;  %v194_v0 = vld [vmem:[%s171_s29] sm:$0xff]  ;;  %v193_v1 = vld [vmem:[#allocation2] sm:$0xff]  ;;  %s342_s17 = sshll.u32 %s556_s12, 3  ;;  %s192_s5 = scalar_lea.vmem [#allocation7], %s338_s26 }
  0x26   : > { %214 = vmatpush.msra.mxu0 %v194_v0  ;;  %s232_s4 = scalar_lea.hbm %s733_s2, %s342_s17  ;;  %s234_s7 = sshll.u32 %s192_s5, 4  ;;  %s235_s7 = int_to_ptr.vmem [resolvable:$true] %s234_s7 }
  0x27   : > { %340 = vmatmul.msk.f32.vlgmr.msra.gmra.mxu0 %vm195_vm0, %v193_v1  ;;  %s236_s8 = sshll.u32 %s232_s4, 4  ;;  %s221_s19 = scalar_lea.sflag [#allocation4], %s685_s25  ;;  %s237_s8 = int_to_ptr.hbm [resolvable:$true] %s236_s8 }
  0x28   : > { %s492_s15 = sshra.s32 %s237_s8, 4  ;;  %s498_s22 = scalar_lea.hbm %s733_s2, 16  ;;  %s493_s15 = int_to_ptr.hbm [resolvable:$true] %s492_s15 }
  0x29   : > { %s494_s16 = scalar_lea.hbm %s493_s15, 8  ;;  %p499_p11 = scmp.lt.s32.totalorder %s493_s15, %s733_s2 }
  0x2a   : > { %p495_p1 = scmp.ne.s32.totalorder %s493_s15, %s494_s16  ;;  %p500_p12 = scmp.lt.s32.totalorder %s498_s22, %s494_s16 }
  0x2c   : > { %p496_p4 = pnand %p495_p1, %p661_p5  ;;  %p501_p13 = por %p500_p12, %p499_p11 }
  0x2e   : > { %p497_p8 = pneg %p496_p4 }
  0x30   : > { %p502_p0 = pnand %p501_p13, %p497_p8 }
  0xa4   : > { %v216_v2 = vpop.f32.mrf.mxu0 }
  0xa5   : > { %219 = vst [vmem:[%s192_s5] sm:$0xff] %v216_v2 }
  0xa6   : > { %505 = shalt.err (!%p502_p0)
}
  0xa7   : > { %351 = dma.vmem_to_hbm [thread:$0]  (%p661_p5), %s235_s7, 128, %s237_s8, %s221_s19  }
  0xa8 PF: > { %s248_s25 = sand.u32 1, %s544_s9   ;;  %p362_p3 = pnand %p333_p9, %p631_p6 }
  0xa9   : > { %s249_s26 = scalar_lea.sflag [#allocation4], %s248_s25 }
  0xaa   : > { %p363_p7 = pneg %p362_p3 }
  0xac   : > { %539 = dma.done.wait (%p363_p7), %s249_s26, 128  }
  0xad   : > { %541 = vsyncadd (%p363_p7), %s249_s26, 4294967168  ;;  %s19_s14 = sadd.s32 1, %s564_s14   ;;  %s741_s9 = smov %s548_s10 }
  0xae   : > { %p16_p10 = scmp.ge.s32.totalorder %s19_s14, 4   ;;  %s742_s10 = smov %s552_s11 }
  0xaf   : > { %s743_s11 = smov %s670_s6  ;;  %s744_s12 = smov %s560_s13 }
  0xb0   : > { %s745_s13 = smov %s747_s27  ;;  %18 = sbr.rel (!%p16_p10) target bundleno = 7 (0x7), region = 78 }
  0xb5   :  { %255 = vsyncpa [#allocation3], 1 }
  0xb6   :  { %257 = vsyncpa [#allocation3 + $0x1], 1 }
  0xb7   :  { %258 = vsyncpa [#allocation6], 1 }
  0xb8   :  { %260 = vsyncpa [#allocation6 + $0x1], 1 }
  0xb9   :  { %261 = vsyncpa [#allocation4], 1 }
  0xba   :  { %263 = vsyncpa [#allocation4 + $0x1], 1 }

</bundles_post_ra>
